<compile_context>
chip_gen: v6e
topology: v6e:2x2x1
jax: 0.10.0
libtpu: 0.0.40
codegen_flags: <defaults>
</compile_context>

<pallas_src>
import math

import jax
import jax.numpy as jnp
from jax.experimental import pallas as pl
from jax.experimental.pallas import tpu as pltpu

_EPS = 1e-5


def _make_kernel(C, T, q_block, compute_dtype):
    nq = T // q_block
    aligned = (q_block % 128 == 0)

    def kernel(x_ref, wq_ref, wkv_ref, wo_ref, o_ref):
        x = x_ref[...]                                            # (C, T), native dtype
        if nq == 1:
            xq = x
        else:
            start = pl.program_id(1) * q_block
            if aligned:
                start = pl.multiple_of(start, 128)
            xq = x_ref[:, pl.ds(start, q_block)]                  # (C, q)

        # Instance-norm stats over time (lane axis), f32 accumulation on the
        # native-dtype tile; single-pass variance clamped at zero.
        mean = jnp.mean(x, axis=1, keepdims=True, dtype=jnp.float32)      # (C, 1)
        m2 = jnp.mean(x * x, axis=1, keepdims=True, dtype=jnp.float32)
        var = jnp.maximum(m2 - mean * mean, 0.0)
        rstd = jax.lax.rsqrt(var + _EPS)
        xn_q = ((xq.astype(jnp.float32) - mean) * rstd).astype(compute_dtype)  # (C, q)

        wq = wq_ref[...]
        wkv = wkv_ref[...]
        wo = wo_ref[...]

        # Projections, weights on the left (NCT preserved).  wq already
        # carries the 1/sqrt(C) attention scale; wkv is the fused [Wk; Wv].
        q = jnp.dot(wq, xn_q,
                    preferred_element_type=jnp.float32).astype(compute_dtype)   # (C, q)
        kv = jnp.dot(wkv, x, preferred_element_type=jnp.float32)                # (2C, T)
        k = kv[:C, :].astype(compute_dtype)
        v = kv[C:, :].astype(compute_dtype)

        # logits[tq, tk] = sum_c q[c, tq] * k[c, tk].  Transposed-LHS
        # contraction only on the small (C, q) tile.
        logits = jax.lax.dot_general(q, k, (((0,), (0,)), ((), ())),
                                     preferred_element_type=jnp.float32)        # (q, T)
        logits = logits - jnp.max(logits, axis=-1, keepdims=True)
        p = jnp.exp(logits)
        l = jnp.sum(p, axis=-1, keepdims=True)                                  # (q, 1)

        # PV in trans_b ('bqd,bkd') form -> (q, C); normalize AFTER the
        # matmul with an exact reciprocal (only q elements).
        ctx = jax.lax.dot_general(p.astype(compute_dtype), v,
                                  (((1,), (1,)), ((), ())),
                                  preferred_element_type=jnp.float32)           # (q, C)
        inv_l = 1.0 / l
        ctx = (ctx * inv_l).astype(compute_dtype)

        # out[c_out, tq] = sum_c wo[c_out, c] * ctx[tq, c]   (trans_b form)
        out = jax.lax.dot_general(wo, ctx, (((1,), (1,)), ((), ())),
                                  preferred_element_type=jnp.float32)           # (C, q)

        o_ref[...] = (xq.astype(jnp.float32) + out).astype(o_ref.dtype)         # residual

    return kernel


def _vmem_capacity_bytes():
    try:
        return int(pltpu.get_tpu_info().vmem_capacity_bytes)
    except Exception:
        return 64 * 2**20        # conservative (v7x per-TC) fallback


def _vmem_need(C, T, q, in_bytes, cd_bytes):
    """Conservative per-grid-step VMEM estimate (incl. 2x pipeline buffers)."""
    return int(2 * C * T * in_bytes            # x block, double-buffered
               + 2 * C * q * in_bytes          # output block, double-buffered
               + 4 * C * C * cd_bytes          # resident weights (wq, wkv, wo)
               + 2 * C * T * (4 + cd_bytes)    # kv f32 accumulator + k/v copies
               + q * T * (8 + cd_bytes)        # logits f32, exp f32, p copy
               + 10 * C * q * 4)               # xn_q / q / ctx / out temporaries


def _pick_q_block(C, T, in_bytes, cd_bytes, budget):
    """Largest q_block (T itself, else a 128-aligned divisor of T) fitting budget."""
    candidates = {T}
    q = 128
    while q < T:
        if T % q == 0:
            candidates.add(q)
        q += 128
    candidates = sorted(candidates, reverse=True)
    for q in candidates:
        if _vmem_need(C, T, q, in_bytes, cd_bytes) <= budget:
            return q
    # Nothing fits: take the smallest tile and let the compiler do its best.
    # TODO(synk): add a flash-style KV grid axis (online softmax) for very long T.
    return candidates[-1]


def content_attention(x_nct, wq, wk, wv, wo, *, q_block=None):
    """x_nct: (B, C, T). w*: (C, C) PyTorch nn.Linear weights (out, in)."""
    B, C, T = x_nct.shape
    compute_dtype = jnp.bfloat16 if x_nct.dtype == jnp.bfloat16 else jnp.float32
    in_bytes = jnp.dtype(x_nct.dtype).itemsize
    cd_bytes = jnp.dtype(compute_dtype).itemsize

    # One-time host-side weight prep: fold 1/sqrt(C) into W_q, fuse K|V,
    # cast to the MXU feed dtype.
    wq_s = (wq * (1.0 / math.sqrt(C))).astype(compute_dtype)
    wkv = jnp.concatenate([wk, wv], axis=0).astype(compute_dtype)        # (2C, C)
    wo_c = wo.astype(compute_dtype)

    cap = _vmem_capacity_bytes()
    budget = int(0.65 * cap)

    if q_block is None:
        q_block = _pick_q_block(C, T, in_bytes, cd_bytes, budget)
    else:
        if T % q_block != 0 or (q_block != T and q_block % 128 != 0):
            raise ValueError("q_block must divide T and be either T or a multiple of 128")
    nq = T // q_block
    need = _vmem_need(C, T, q_block, in_bytes, cd_bytes)
    vmem_limit = int(max(32 * 2**20, min(int(0.9 * cap), int(1.35 * need))))

    full_spec = pl.BlockSpec((pl.Squeezed(), C, T), lambda b, qi: (b, 0, 0))
    out_spec = pl.BlockSpec((pl.Squeezed(), C, q_block), lambda b, qi: (b, 0, qi))
    # Weights: whole-array, resident in VMEM (constant across the grid, so no
    # per-step pipelining / double-buffering of these operands).
    w_spec = pl.BlockSpec(memory_space=pltpu.MemorySpace.VMEM)

    kernel = _make_kernel(C, T, q_block, compute_dtype)

    # Advisory cost for the XLA scheduler.
    flops = B * (2 * C * C * T              # Q projection (summed over q tiles)
                 + nq * 4 * C * C * T       # fused K|V projection (recomputed per q tile)
                 + 2 * C * C * T            # output projection
                 + 4 * C * T * T)           # logits + PV matmuls
    bytes_accessed = (B * C * T * in_bytes          # x read (block constant across qi)
                      + B * C * T * in_bytes        # output write
                      + 4 * C * C * cd_bytes)       # weights
    cost = pl.CostEstimate(flops=int(flops), transcendentals=int(B * T * T),
                           bytes_accessed=int(bytes_accessed))

    return pl.pallas_call(
        kernel,
        out_shape=jax.ShapeDtypeStruct((B, C, T), x_nct.dtype),
        grid_spec=pltpu.PrefetchScalarGridSpec(
            num_scalar_prefetch=0,
            grid=(B, nq),
            in_specs=[full_spec, w_spec, w_spec, w_spec],
            out_specs=out_spec,
        ),
        compiler_params=pltpu.CompilerParams(
            dimension_semantics=("parallel", "parallel"),
            vmem_limit_bytes=vmem_limit,
        ),
        cost_estimate=cost,
    )(x_nct, wq_s, wkv, wo_c)


def _reference(x_nct, wq, wk, wv, wo):
    """Pure-JAX reference mirroring the PyTorch forward."""
    C = x_nct.shape[1]
    mean = jnp.mean(x_nct, axis=-1, keepdims=True)
    var = jnp.mean((x_nct - mean) ** 2, axis=-1, keepdims=True)
    xn = (x_nct - mean) / jnp.sqrt(var + _EPS)
    q = jnp.einsum('bct,oc->bto', xn, wq)
    k = jnp.einsum('bct,oc->bto', x_nct, wk)
    v = jnp.einsum('bct,oc->bto', x_nct, wv)
    attn = jax.nn.softmax(jnp.einsum('bqc,bkc->bqk', q / (C ** 0.5), k), axis=-1)
    out = jnp.einsum('bqk,bkc->bqc', attn, v)
    out = jnp.einsum('btc,oc->bto', out, wo)
    return x_nct + jnp.transpose(out, (0, 2, 1))


def _rand_weights(keys, C):
    bound = 1.0 / math.sqrt(C)
    return [jax.random.uniform(k, (C, C), jnp.float32, -bound, bound) for k in keys]


if __name__ == "__main__":
    key = jax.random.PRNGKey(0)
    keys = jax.random.split(key, 10)

    # --- Small correctness shape (nq == 1 path) ---------------------------
    B, C, T = 2, 32, 16
    x = jax.random.normal(keys[0], (B, C, T), dtype=jnp.float32)
    wq, wk, wv, wo = _rand_weights(keys[1:5], C)

    y = content_attention(x, wq, wk, wv, wo)
    jax.block_until_ready(y)
    y_ref = _reference(x, wq, wk, wv, wo)
    assert y.shape == (B, C, T)
    assert jnp.allclose(y, y_ref, atol=2e-3, rtol=2e-3), "mismatch vs reference (small)"

    # --- Lane-aligned shape exercising the q-tiled path (nq = 4) ----------
    B2, C2, T2 = 1, 128, 512
    x2 = jax.random.normal(keys[5], (B2, C2, T2), dtype=jnp.float32)
    wq2, wk2, wv2, wo2 = _rand_weights(keys[6:10], C2)

    y2 = content_attention(x2, wq2, wk2, wv2, wo2, q_block=128)
    jax.block_until_ready(y2)
    y2_ref = _reference(x2, wq2, wk2, wv2, wo2)
    assert y2.shape == (B2, C2, T2)
    assert jnp.allclose(y2, y2_ref, atol=2e-3, rtol=2e-3), "mismatch vs reference (tiled)"

    print("KERNEL_OK")
</pallas_src>

<mosaic_0001>
module attributes {stable_mosaic.version = 11 : i64} {
  func.func @kernel(%arg0: i32, %arg1: i32, %arg2: memref<1x32x16xf32, #tpu.memory_space<vmem>>, %arg3: memref<32x32xf32, #tpu.memory_space<vmem>>, %arg4: memref<64x32xf32, #tpu.memory_space<vmem>>, %arg5: memref<32x32xf32, #tpu.memory_space<vmem>>, %arg6: memref<1x32x16xf32, #tpu.memory_space<vmem>>) attributes {dimension_semantics = [#tpu.dimension_semantics<parallel>, #tpu.dimension_semantics<parallel>], iteration_bounds = array<i64: 2, 1>, scalar_prefetch = 0 : i64, scratch_operands = 0 : i64, tpu.core_type = #tpu.core_type<tc>, window_params = [{transform_indices = @transform_0, window_bounds = array<i64: 1, 32, 16>}, {pipeline_mode = #tpu.pipeline_mode<synchronous>, transform_indices = @transform_1, window_bounds = array<i64: 32, 32>}, {pipeline_mode = #tpu.pipeline_mode<synchronous>, transform_indices = @transform_2, window_bounds = array<i64: 64, 32>}, {pipeline_mode = #tpu.pipeline_mode<synchronous>, transform_indices = @transform_3, window_bounds = array<i64: 32, 32>}, {transform_indices = @transform_4, window_bounds = array<i64: 1, 32, 16>}]} {
    %c0 = arith.constant 0 : index
    %c0_0 = arith.constant 0 : index
    %c0_1 = arith.constant 0 : index
    %0 = vector.load %arg2[%c0, %c0_0, %c0_1] : memref<1x32x16xf32, #tpu.memory_space<vmem>>, vector<1x32x16xf32>
    %1 = vector.shape_cast %0 : vector<1x32x16xf32> to vector<32x16xf32>
    %cst = arith.constant dense<0.000000e+00> : vector<32xf32>
    %2 = vector.multi_reduction <add>, %1, %cst [1] : vector<32x16xf32> to vector<32xf32>
    %3 = vector.shape_cast %2 : vector<32xf32> to vector<32x1xf32>
    %cst_2 = arith.constant 1.600000e+01 : f32
    %4 = vector.broadcast %cst_2 : f32 to vector<32x1xf32>
    %5 = arith.divf %3, %4 : vector<32x1xf32>
    %6 = arith.mulf %1, %1 : vector<32x16xf32>
    %cst_3 = arith.constant dense<0.000000e+00> : vector<32xf32>
    %7 = vector.multi_reduction <add>, %6, %cst_3 [1] : vector<32x16xf32> to vector<32xf32>
    %8 = vector.shape_cast %7 : vector<32xf32> to vector<32x1xf32>
    %cst_4 = arith.constant 1.600000e+01 : f32
    %9 = vector.broadcast %cst_4 : f32 to vector<32x1xf32>
    %10 = arith.divf %8, %9 : vector<32x1xf32>
    %11 = arith.mulf %5, %5 : vector<32x1xf32>
    %12 = arith.subf %10, %11 : vector<32x1xf32>
    %cst_5 = arith.constant 0.000000e+00 : f32
    %13 = vector.broadcast %cst_5 : f32 to vector<32x1xf32>
    %14 = arith.maximumf %12, %13 : vector<32x1xf32>
    %cst_6 = arith.constant 9.99999974E-6 : f32
    %15 = vector.broadcast %cst_6 : f32 to vector<32x1xf32>
    %16 = arith.addf %14, %15 : vector<32x1xf32>
    %17 = math.rsqrt %16 : vector<32x1xf32>
    %18 = vector.broadcast %5 : vector<32x1xf32> to vector<32x16xf32>
    %19 = arith.subf %1, %18 : vector<32x16xf32>
    %20 = vector.broadcast %17 : vector<32x1xf32> to vector<32x16xf32>
    %21 = arith.mulf %19, %20 : vector<32x16xf32>
    %c0_7 = arith.constant 0 : index
    %c0_8 = arith.constant 0 : index
    %22 = vector.load %arg3[%c0_7, %c0_8] : memref<32x32xf32, #tpu.memory_space<vmem>>, vector<32x32xf32>
    %c0_9 = arith.constant 0 : index
    %c0_10 = arith.constant 0 : index
    %23 = vector.load %arg4[%c0_9, %c0_10] : memref<64x32xf32, #tpu.memory_space<vmem>>, vector<64x32xf32>
    %c0_11 = arith.constant 0 : index
    %c0_12 = arith.constant 0 : index
    %24 = vector.load %arg5[%c0_11, %c0_12] : memref<32x32xf32, #tpu.memory_space<vmem>>, vector<32x32xf32>
    %cst_13 = arith.constant dense<0.000000e+00> : vector<32x16xf32>
    %25 = tpu.matmul %22, %21, %cst_13 {dimension_numbers = #tpu.dot_dimension_numbers<[1], [0], [0], [1], [0, 0, 1, 1], [], []>} : vector<32x32xf32>, vector<32x16xf32>, vector<32x16xf32> -> vector<32x16xf32>
    %cst_14 = arith.constant dense<0.000000e+00> : vector<64x16xf32>
    %26 = tpu.matmul %23, %1, %cst_14 {dimension_numbers = #tpu.dot_dimension_numbers<[1], [0], [0], [1], [0, 0, 1, 1], [], []>} : vector<64x32xf32>, vector<32x16xf32>, vector<64x16xf32> -> vector<64x16xf32>
    %27 = vector.extract_strided_slice %26 {offsets = [0, 0], sizes = [32, 16], strides = [1, 1]} : vector<64x16xf32> to vector<32x16xf32>
    %28 = vector.extract_strided_slice %26 {offsets = [32, 0], sizes = [32, 16], strides = [1, 1]} : vector<64x16xf32> to vector<32x16xf32>
    %cst_15 = arith.constant dense<0.000000e+00> : vector<16x16xf32>
    %29 = tpu.matmul %25, %27, %cst_15 {dimension_numbers = #tpu.dot_dimension_numbers<[0], [0], [1], [1], [0, 1, 1, 1], [], []>} : vector<32x16xf32>, vector<32x16xf32>, vector<16x16xf32> -> vector<16x16xf32>
    %cst_16 = arith.constant dense<0xFF800000> : vector<16xf32>
    %30 = vector.multi_reduction <maximumf>, %29, %cst_16 [1] : vector<16x16xf32> to vector<16xf32>
    %31 = vector.shape_cast %30 : vector<16xf32> to vector<16x1xf32>
    %32 = vector.broadcast %31 : vector<16x1xf32> to vector<16x16xf32>
    %33 = arith.subf %29, %32 : vector<16x16xf32>
    %34 = math.exp %33 : vector<16x16xf32>
    %cst_17 = arith.constant dense<0.000000e+00> : vector<16xf32>
    %35 = vector.multi_reduction <add>, %34, %cst_17 [1] : vector<16x16xf32> to vector<16xf32>
    %36 = vector.shape_cast %35 : vector<16xf32> to vector<16x1xf32>
    %cst_18 = arith.constant dense<0.000000e+00> : vector<16x32xf32>
    %37 = tpu.matmul %34, %28, %cst_18 {dimension_numbers = #tpu.dot_dimension_numbers<[1], [1], [0], [0], [0, 0, 1, 0], [], []>} : vector<16x16xf32>, vector<32x16xf32>, vector<16x32xf32> -> vector<16x32xf32>
    %cst_19 = arith.constant 1.000000e+00 : f32
    %38 = vector.broadcast %cst_19 : f32 to vector<16x1xf32>
    %39 = arith.divf %38, %36 : vector<16x1xf32>
    %40 = vector.broadcast %39 : vector<16x1xf32> to vector<16x32xf32>
    %41 = arith.mulf %37, %40 : vector<16x32xf32>
    %cst_20 = arith.constant dense<0.000000e+00> : vector<32x16xf32>
    %42 = tpu.matmul %24, %41, %cst_20 {dimension_numbers = #tpu.dot_dimension_numbers<[1], [1], [0], [0], [0, 0, 1, 0], [], []>} : vector<32x32xf32>, vector<16x32xf32>, vector<32x16xf32> -> vector<32x16xf32>
    %43 = arith.addf %1, %42 : vector<32x16xf32>
    %c0_21 = arith.constant 0 : index
    %c0_22 = arith.constant 0 : index
    %c0_23 = arith.constant 0 : index
    %44 = vector.load %arg6[%c0_21, %c0_22, %c0_23] : memref<1x32x16xf32, #tpu.memory_space<vmem>>, vector<1x32x16xf32>
    %45 = vector.shape_cast %44 : vector<1x32x16xf32> to vector<32x16xf32>
    %46 = vector.shape_cast %43 : vector<32x16xf32> to vector<1x32x16xf32>
    tpu.vector_store %arg6[%c0_21, %c0_22, %c0_23], %46 {strides = array<i32>} : memref<1x32x16xf32, #tpu.memory_space<vmem>>, vector<1x32x16xf32>,
    return
  }
  func.func @transform_0(%arg0: i32, %arg1: i32) -> (i32, i32, i32) {
    %c0_i32 = arith.constant 0 : i32
    %c0_i32_0 = arith.constant 0 : i32
    %c0_i32_1 = arith.constant 0 : i32
    return %arg0, %c0_i32, %c0_i32_0 : i32, i32, i32
  }
  func.func @transform_1(%arg0: i32, %arg1: i32) -> (i32, i32) {
    %c0_i32 = arith.constant 0 : i32
    %c0_i32_0 = arith.constant 0 : i32
    %c0_i32_1 = arith.constant 0 : i32
    return %c0_i32, %c0_i32_0 : i32, i32
  }
  func.func @transform_2(%arg0: i32, %arg1: i32) -> (i32, i32) {
    %c0_i32 = arith.constant 0 : i32
    %c0_i32_0 = arith.constant 0 : i32
    %c0_i32_1 = arith.constant 0 : i32
    return %c0_i32, %c0_i32_0 : i32, i32
  }
  func.func @transform_3(%arg0: i32, %arg1: i32) -> (i32, i32) {
    %c0_i32 = arith.constant 0 : i32
    %c0_i32_0 = arith.constant 0 : i32
    %c0_i32_1 = arith.constant 0 : i32
    return %c0_i32, %c0_i32_0 : i32, i32
  }
  func.func @transform_4(%arg0: i32, %arg1: i32) -> (i32, i32, i32) {
    %c0_i32 = arith.constant 0 : i32
    %c0_i32_0 = arith.constant 0 : i32
    return %arg0, %c0_i32, %arg1 : i32, i32, i32
  }
}

</mosaic_0001>

<bundles_post_ra>
// kernel: tpu_custom_call.1
= control target key start
LH: loop header
LB: loop body
LE: loop exit
PB: predicated region body
PF: predicated region fallthrough
CT: control target
= control target key end

     0   :  { %s1182_s15 = smov 0   ;;  %s1184_s16 = smov 0   ;;  %s1354_s0 = inlined_call_operand.vmem [shape: f32[2,32,16], index: 0, kind: input, shape index: {}]   ;;  %s1355_s1 = inlined_call_operand.vmem [shape: f32[32,32], index: 1, kind: input, shape index: {}]   ;;  %s1356_s2 = inlined_call_operand.vmem [shape: f32[64,32], index: 2, kind: input, shape index: {}]   ;;  %s1357_s3 = inlined_call_operand.vmem [shape: f32[32,32], index: 3, kind: input, shape index: {}]   ;;  %s1358_s4 = inlined_call_operand.vmem [shape: f32[2,32,16], index: 4, kind: output, shape index: {}]  }
   0x1   :  { %s1186_s17 = smov 0  }
   0x2 LB: > { %s26_s18 = sadd.s32 1, %s1151_s16  ;;  %p953_p0 = scmp.ge.s32.totalorder %s1155_s17, 1  ;;  %s1155_s17 = sphi %s1186_s17, %s14_s17   ;;  %s1151_s16 = sphi %s1184_s16, %s1360_s16   ;;  %s1147_s15 = sphi %s1182_s15, %s1359_s15  }
   0x3   : > { %p28_p1 = scmp.ge.s32.totalorder %s26_s18, 2  ;;  %p176_p2 = scmp.lt.s32.totalorder %s1155_s17, 3 }
   0x5   : > { %s1362_s18 = smov (%p28_p1, %s26_s18), 0  ;;  %p177_p3 = pnand %p953_p0, %p176_p2 }
   0x6   : > { %p205_p4 = scmp.lt.s32.totalorder (!%p177_p3), %s1147_s15, 1 }
   0x7   : > { %180 = sbr.rel (%p177_p3) target bundleno = 1280 (0x500), region = 36 }
   0xc   : > { %s1364_s15 = smov (!%p205_p4, %s1147_s15), 1  ;;  %vm222_vm0 = vcmask 130048   ;;  %v288_v16 = vld [vmem:[%s1355_s1] sm:$0xff]  ;;  %vm304_vm1 = vcmask 261120   ;;  %v293_v18 = vld [vmem:[%s1356_s2 + $0x8] sm:$0xff]  ;;  %v294_v19 = vld [vmem:[%s1356_s2 + $0x10] sm:$0xff] }
   0xd   : > { %s986_s19 = sshll.u32 %s1364_s15, 5  ;;  %1034 = vmatprep.mubr.msk.f32.mxu0 %vm304_vm1, %v288_v16  ;;  %v292_v17 = vld [vmem:[%s1356_s2] sm:$0xff]  ;;  %v295_v20 = vld [vmem:[%s1356_s2 + $0x18] sm:$0xff]  ;;  %v298_v16 = vld [vmem:[%s1356_s2 + $0x30] sm:$0xff] }
   0xe   : > { %s209_s22 = scalar_lea.vmem %s1354_s0, %s986_s19  ;;  %1048 = vmatprep.mubr.msk.f32.mxu1 %vm304_vm1, %v292_v17  ;;  %s217_s10 = scalar_lea.vmem %s1358_s4, %s986_s19 }
   0xf   : > { %v1208_v0 = vld [vmem:[%s209_s22 + $0x18] sm:$0xff]  ;;  %v1210_v1 = vld [vmem:[%s209_s22 + $0x8] sm:$0xff]  ;;  %v1212_v2 = vld [vmem:[%s209_s22 + $0x10] sm:$0xff] }
  0x10   : > { %v232_v3 = vsel %vm222_vm0, %v1208_v0, 0.0  ;;  %v226_v4 = vsel %vm222_vm0, %v1210_v1, 0.0  ;;  %v243_v5 = vmul.f32 %v1208_v0, %v1208_v0  ;;  %1040 = vmatprep.subr.mxu1 %v1208_v0  ;;  %v229_v6 = vsel %vm222_vm0, %v1212_v2, 0.0  ;;  %v1227_v9 = vld [vmem:[%s209_s22] sm:$0xff] }
  0x11   : > { %233 = vadd.xlane.f32.xlu0 %v232_v3  ;;  %227 = vadd.xlane.f32.xlu1 %v226_v4  ;;  %v242_v8 = vmul.f32 %v1212_v2, %v1212_v2  ;;  %v223_v11 = vsel %vm222_vm0, %v1227_v9, 0.0  ;;  %v241_v12 = vmul.f32 %v1210_v1, %v1210_v1  ;;  %v240_v13 = vmul.f32 %v1227_v9, %v1227_v9  ;;  %v289_v4 = vld [vmem:[%s1355_s1 + $0x8] sm:$0xff] }
  0x12   : > { %v253_v7 = vsel %vm222_vm0, %v243_v5, 0.0  ;;  %1041 = vmatpush3.msra.mxu1 %v1208_v0  ;;  %v290_v5 = vld [vmem:[%s1355_s1 + $0x10] sm:$0xff] }
  0x13   : > { %1042 = vmatprep.subr.mxu1 %v1212_v2  ;;  %v250_v10 = vsel %vm222_vm0, %v242_v8, 0.0  ;;  %v247_v14 = vsel %vm222_vm0, %v241_v12, 0.0  ;;  %v244_v15 = vsel %vm222_vm0, %v240_v13, 0.0 }
  0x14   : > { %1043 = vmatpush3.msra.mxu1 %v1212_v2 }
  0x15   : > { %230 = vadd.xlane.f32.xlu0 %v229_v6  ;;  %254 = vadd.xlane.f32.xlu1 %v253_v7  ;;  %v291_v6 = vld [vmem:[%s1355_s1 + $0x18] sm:$0xff] }
  0x16   : > { %1044 = vmatprep.subr.mxu1 %v1210_v1 }
  0x17   : > { %1045 = vmatpush3.msra.mxu1 %v1210_v1 }
  0x18   : > { %1046 = vmatprep.subr.mxu1 %v1227_v9 }
  0x19   : > { %251 = vadd.xlane.f32.xlu0 %v250_v10  ;;  %224 = vadd.xlane.f32.xlu1 %v223_v11 }
  0x1a   : > { %1047 = vmatpush3.msra.mxu1 %v1227_v9 }
  0x1b   : > { %1049 = vmatmul.mubr.msk.f32.vlgmr.msra.gmra.mxu1 %vm304_vm1, %v293_v18  ;;  %v299_v18 = vld [vmem:[%s1356_s2 + $0x38] sm:$0xff] }
  0x1c   : > { %1051 = vmatprep.mubr.msk.f32.mxu1 %vm304_vm1, %v294_v19 }
  0x1d   : > { %248 = vadd.xlane.f32.xlu0 %v247_v14  ;;  %245 = vadd.xlane.f32.xlu1 %v244_v15  ;;  %v296_v14 = vld [vmem:[%s1356_s2 + $0x20] sm:$0xff]  ;;  %v297_v15 = vld [vmem:[%s1356_s2 + $0x28] sm:$0xff] }
  0x1f   : > { %1052 = vmatmul.mubr.msk.f32.gmra.mxu1 %vm304_vm1, %v295_v20 }
  0x20   : > { %1054 = vmatprep.mubr.msk.f32.mxu1 %vm304_vm1, %v296_v14 }
  0x23   : > { %1055 = vmatmul.mubr.msk.f32.gmra.mxu1 %vm304_vm1, %v297_v15 }
  0x24   : > { %1057 = vmatprep.mubr.msk.f32.mxu1 %vm304_vm1, %v298_v16 }
  0x27   : > { %1058 = vmatmul.mubr.msk.f32.gmra.mxu1 %vm304_vm1, %v299_v18 }
  0x9a   : > { %v234_v21 = vpop.xlane.xlu0 %233  ;;  %v228_v22 = vpop.xlane.xlu1 %227 }
  0x9b   : > { %v239_v23 = vmul.f32 0.0625, %v234_v21  ;;  %v237_v30 = vmul.f32 0.0625, %v228_v22 }
  0x9d   : > { %v263_v26 = vmul.f32 %v239_v23, %v239_v23  ;;  %v261_v40 = vmul.f32 %v237_v30, %v237_v30  ;;  %v283_v53 = vsub.f32 %v1208_v0, %v239_v23  ;;  %v281_v59 = vsub.f32 %v1210_v1, %v237_v30 }
  0x9e   : > { %v231_v24 = vpop.xlane.xlu0 %230  ;;  %v255_v25 = vpop.xlane.xlu1 %254 }
  0x9f   : > { %v238_v27 = vmul.f32 0.0625, %v231_v24  ;;  %v259_v28 = vmul.f32 0.0625, %v255_v25 }
  0xa1   : > { %v267_v29 = vsub.f32 %v259_v28, %v263_v26  ;;  %v262_v33 = vmul.f32 %v238_v27, %v238_v27  ;;  %v282_v56 = vsub.f32 %v1212_v2, %v238_v27 }
  0xa2   : > { %v252_v31 = vpop.xlane.xlu0 %251  ;;  %v225_v32 = vpop.xlane.xlu1 %224 }
  0xa3   : > { %v271_v34 = vmax.f32 %v267_v29, 0.0  ;;  %v258_v35 = vmul.f32 0.0625, %v252_v31  ;;  %v236_v36 = vmul.f32 0.0625, %v225_v32 }
  0xa5   : > { %v275_v37 = vadd.f32 1e-05, %v271_v34  ;;  %v266_v38 = vsub.f32 %v258_v35, %v262_v33  ;;  %v260_v39 = vmul.f32 %v236_v36, %v236_v36  ;;  %v280_v62 = vsub.f32 %v1227_v9, %v236_v36 }
  0xa6   : > { %v249_v41 = vpop.xlane.xlu0 %248  ;;  %v246_v42 = vpop.xlane.xlu1 %245 }
  0xa7   : > { %1117 = vrsqrt.f32 %v275_v37  ;;  %v270_v43 = vmax.f32 %v266_v38, 0.0  ;;  %v257_v44 = vmul.f32 0.0625, %v249_v41  ;;  %v256_v45 = vmul.f32 0.0625, %v246_v42 }
  0xa9   : > { %v274_v46 = vadd.f32 1e-05, %v270_v43  ;;  %v265_v47 = vsub.f32 %v257_v44, %v261_v40  ;;  %v264_v48 = vsub.f32 %v256_v45, %v260_v39  ;;  %v300_v40 = vld [vmem:[%s1357_s3] sm:$0xff] }
  0xab   : > { %1119 = vrsqrt.f32 %v274_v46  ;;  %v269_v49 = vmax.f32 %v265_v47, 0.0  ;;  %v268_v50 = vmax.f32 %v264_v48, 0.0 }
  0xad   : > { %v273_v51 = vadd.f32 1e-05, %v269_v49  ;;  %v272_v52 = vadd.f32 1e-05, %v268_v50  ;;  %v301_v49 = vld [vmem:[%s1357_s3 + $0x8] sm:$0xff]  ;;  %v302_v50 = vld [vmem:[%s1357_s3 + $0x10] sm:$0xff] }
  0xaf   : > { %1121 = vrsqrt.f32 %v273_v51  ;;  %v303_v51 = vld [vmem:[%s1357_s3 + $0x18] sm:$0xff] }
  0xb0   : > { %1123 = vrsqrt.f32 %v272_v52 }
  0xb4   : > { %v1118_v54 = vpop.eup %1117 }
  0xb5   : > { %v287_v55 = vmul.f32 %v1118_v54, %v283_v53 }
  0xb7   : > { %1026 = vmatprep.subr.mxu0 %v287_v55 }
  0xb8   : > { %v1120_v57 = vpop.eup %1119  ;;  %1027 = vmatpush3.msra.mxu0 %v287_v55 }
  0xb9   : > { %v286_v58 = vmul.f32 %v1120_v57, %v282_v56 }
  0xbb   : > { %1028 = vmatprep.subr.mxu0 %v286_v58 }
  0xbc   : > { %v1122_v60 = vpop.eup %1121  ;;  %1029 = vmatpush3.msra.mxu0 %v286_v58 }
  0xbd   : > { %v1124_v61 = vpop.eup %1123  ;;  %v285_v63 = vmul.f32 %v1122_v60, %v281_v59 }
  0xbe   : > { %v284_v3 = vmul.f32 %v1124_v61, %v280_v62 }
  0xbf   : > { %1030 = vmatprep.subr.mxu0 %v285_v63 }
  0xc0   : > { %1031 = vmatpush3.msra.mxu0 %v285_v63 }
  0xc1   : > { %1032 = vmatprep.subr.mxu0 %v284_v3 }
  0xc2   : > { %1033 = vmatpush3.msra.mxu0 %v284_v3 }
  0xc3   : > { %1035 = vmatmul.mubr.msk.f32.vlgmr.msra.gmra.mxu0 %vm304_vm1, %v289_v4 }
  0xc4   : > { %1037 = vmatprep.mubr.msk.f32.mxu0 %vm304_vm1, %v290_v5 }
  0xc7   : > { %1038 = vmatmul.mubr.msk.f32.gmra.mxu0 %vm304_vm1, %v291_v6 }
  0xdb   : > { %v1050_v7 = vpop.f32.mrf.mxu1 }
  0xdd   : > { %v492_v8 = vpop.f32.mrf.mxu1 }
  0xdf   : > { %v1053_v10 = vpop.f32.mrf.mxu1 }
  0xe0   : > { %1060 = vmatprep.subr.mxu0 %v1053_v10 }
  0xe1   : > { %v502_v11 = vpop.f32.mrf.mxu1  ;;  %1061 = vmatpush3.msra.mxu0 %v1053_v10 }
  0xe2   : > { %1062 = vmatprep.subr.mxu0 %v502_v11 }
  0xe3   : > { %1063 = vmatpush3.msra.mxu0 %v502_v11  ;;  %v1056_v22 = vpop.f32.mrf.mxu1 }
  0xe4   : > { %1064 = vmatprep.subr.mxu0 %v1050_v7 }
  0xe5   : > { %1065 = vmatpush3.msra.mxu0 %v1050_v7  ;;  %v512_v23 = vpop.f32.mrf.mxu1 }
  0xe6   : > { %1066 = vmatprep.subr.mxu0 %v492_v8 }
  0xe7   : > { %1067 = vmatpush3.msra.mxu0 %v492_v8  ;;  %v1059_v24 = vpop.f32.mrf.mxu1 }
  0xe8   : > { %1071 = vmatprep.subr.msk.mxu1 %vm222_vm0, %v1059_v24 }
  0xe9   : > { %1072 = vmatpush3.xpose.msk.msra.mxu1 %vm222_vm0, %v1059_v24  ;;  %v522_v25 = vpop.f32.mrf.mxu1 }
  0xea   : > { %1073 = vmatprep.subr.msk.mxu1 %vm222_vm0, %v522_v25 }
  0xed   : > { %1074 = vmatpush3.xpose.msk.msra.mxu1 %vm222_vm0, %v522_v25 }
  0xee   : > { %1075 = vmatprep.subr.msk.mxu1 %vm222_vm0, %v1056_v22 }
  0xf1   : > { %1076 = vmatpush3.xpose.msk.msra.mxu1 %vm222_vm0, %v1056_v22 }
  0xf2   : > { %1077 = vmatprep.subr.msk.mxu1 %vm222_vm0, %v512_v23 }
  0xf5   : > { %1078 = vmatpush3.xpose.msk.msra.mxu1 %vm222_vm0, %v512_v23 }
 0x183   : > { %v1036_v12 = vpop.f32.mrf.mxu0 }
 0x185   : > { %v383_v13 = vpop.f32.mrf.mxu0 }
 0x186   : > { %531 = vxpose.xlu0.b32.start [1/4] (short) (narrow) %v383_v13, 16 }
 0x187   : > { %v1039_v17 = vpop.f32.mrf.mxu0 }
 0x189   : > { %v393_v19 = vpop.f32.mrf.mxu0 }
 0x18a   : > { %532 = vxpose.xlu0.b32.cont [2/4] (short) (narrow) %v1036_v12, 16 }
 0x18e   : > { %533 = vxpose.xlu0.b32.cont [3/4] (short) (narrow) %v393_v19, 16 }
 0x192   : > { %534 = vxpose.xlu0.b32.end [4/4] (short) (narrow) %v1039_v17, 16 }
 0x202   : > { %v547_v20 = vpop.trf.xlu0 }
 0x203   : > { %1068 = vmatprep.mubr.msk.f32.mxu0 %vm304_vm1, %v547_v20 }
 0x206   : > { %v548_v21 = vpop.trf.xlu0 }
 0x207   : > { %1069 = vmatmul.mubr.msk.f32.vlgmr.msra.gmra.mxu0 %vm304_vm1, %v548_v21 }
 0x208   : > { %1086 = vmatprep.mubr.msk.f32.mxu0 %vm304_vm1, %v300_v40 }
 0x2c7   : > { %v1070_v26 = vpop.f32.mrf.mxu0 }
 0x2c8   : > { %v647_v29 = vsel %vm222_vm0, %v1070_v26, -inf }
 0x2c9   : > { %v635_v27 = vpop.f32.mrf.mxu0 }
 0x2ca   : > { %v644_v28 = vsel %vm222_vm0, %v635_v27, -inf }
 0x2cb   : > { %645 = vmax.xlane.f32.xlu1 %v644_v28 }
 0x2cf   : > { %648 = vmax.xlane.f32.xlu1 %v647_v29 }
 0x354   : > { %v646_v30 = vpop.xlane.xlu1 %645 }
 0x355   : > { %v650_v31 = vsub.f32 %v635_v27, %v646_v30 }
 0x357   : > { %v652_v32 = vmul.f32 1.442695, %v650_v31 }
 0x358   : > { %v649_v33 = vpop.xlane.xlu1 %648 }
 0x359   : > { %1125 = vpow2.f32 %v652_v32  ;;  %v651_v34 = vsub.f32 %v1070_v26, %v649_v33 }
 0x35b   : > { %v654_v35 = vmul.f32 1.442695, %v651_v34 }
 0x35d   : > { %1127 = vpow2.f32 %v654_v35 }
 0x366   : > { %v1126_v36 = vpop.eup %1125 }
 0x367   : > { %1079 = vmatprep.mubr.msk.f32.mxu1 %vm222_vm0, %v1126_v36  ;;  %v656_v39 = vsel %vm222_vm0, %v1126_v36, 0.0 }
 0x36a   : > { %v1128_v37 = vpop.eup %1127 }
 0x36b   : > { %1080 = vmatmul.mubr.msk.f32.vlgmr.msra.gmra.mxu1 %vm222_vm0, %v1128_v37  ;;  %v659_v38 = vsel %vm222_vm0, %v1128_v37, 0.0 }
 0x36c   : > { %660 = vadd.xlane.f32.xlu1 %v659_v38 }
 0x370   : > { %657 = vadd.xlane.f32.xlu1 %v656_v39 }
 0x3f5   : > { %v661_v41 = vpop.xlane.xlu1 %660 }
 0x3f6   : > { %1129 = vrcp.f32 %v661_v41 }
 0x3f9   : > { %v658_v42 = vpop.xlane.xlu1 %657 }
 0x3fa   : > { %1131 = vrcp.f32 %v658_v42 }
 0x403   : > { %v1130_v43 = vpop.eup %1129 }
 0x407   : > { %v1132_v46 = vpop.eup %1131 }
 0x42b   : > { %v1081_v44 = vpop.f32.mrf.mxu1 }
 0x42c   : > { %v760_v45 = vmul.f32 %v1130_v43, %v1081_v44 }
 0x42d   : > { %v746_v47 = vpop.f32.mrf.mxu1 }
 0x42e   : > { %v759_v48 = vmul.f32 %v1132_v46, %v746_v47  ;;  %1082 = vmatprep.subr.msk.mxu0 %vm304_vm1, %v760_v45 }
 0x42f   : > { %1083 = vmatpush3.xpose.msk.msra.mxu0 %vm304_vm1, %v760_v45 }
 0x430   : > { %1084 = vmatprep.subr.msk.mxu0 %vm304_vm1, %v759_v48 }
 0x433   : > { %1085 = vmatpush3.xpose.msk.msra.mxu0 %vm304_vm1, %v759_v48 }
 0x436   : > { %1087 = vmatmul.mubr.msk.f32.vlgmr.msra.gmra.mxu0 %vm304_vm1, %v301_v49 }
 0x437   : > { %1089 = vmatprep.mubr.msk.f32.mxu0 %vm304_vm1, %v302_v50 }
 0x43a   : > { %1090 = vmatmul.mubr.msk.f32.gmra.mxu0 %vm304_vm1, %v303_v51 }
 0x4f6   : > { %v1088_v52 = vpop.f32.mrf.mxu0 }
 0x4f7   : > { %v865_v53 = vadd.f32 %v1088_v52, %v1210_v1 }
 0x4f8   : > { %v845_v54 = vpop.f32.mrf.mxu0 }
 0x4f9   : > { %869 = vst.msk [vmem:[%s217_s10 + $0x8] sm:$0xff] %vm222_vm0, %v865_v53  ;;  %v864_v55 = vadd.f32 %v845_v54, %v1227_v9 }
 0x4fa   : > { %v1091_v56 = vpop.f32.mrf.mxu0 }
 0x4fb   : > { %868 = vst.msk [vmem:[%s217_s10] sm:$0xff] %vm222_vm0, %v864_v55  ;;  %v867_v57 = vadd.f32 %v1091_v56, %v1208_v0 }
 0x4fc   : > { %v855_v58 = vpop.f32.mrf.mxu0 }
 0x4fd   : > { %871 = vst.msk [vmem:[%s217_s10 + $0x18] sm:$0xff] %vm222_vm0, %v867_v57  ;;  %v866_v59 = vadd.f32 %v855_v58, %v1212_v2 }
 0x4ff   : > { %870 = vst.msk [vmem:[%s217_s10 + $0x10] sm:$0xff] %vm222_vm0, %v866_v59 }
 0x500 PF: > { %s14_s17 = sadd.s32 1, %s1155_s17   ;;  %s1359_s15 = smov %s1151_s16 }
 0x501   : > { %p11_p5 = scmp.ge.s32.totalorder %s14_s17, 4   ;;  %s1360_s16 = smov %s1362_s18 }
 0x503   :  { %13 = sbr.rel (!%p11_p5) target bundleno = 2 (0x2), region = 66 }

</bundles_post_ra>
